<compile_context>
chip_gen: v6e
topology: v6e:2x2x1
jax: 0.10.0
libtpu: 0.0.40
codegen_flags: <defaults>
</compile_context>

<pallas_src>
import jax
import jax.numpy as jnp
import numpy as np
from jax.experimental import pallas as pl
from jax.experimental.pallas import tpu as pltpu


# --------------------------------------------------------------------------- #
# Buffer construction (same math as the PyTorch __init__).
# --------------------------------------------------------------------------- #
def make_positional_encoding(d_model: int, max_len: int = 512,
                             dtype=jnp.float32) -> jnp.ndarray:
    position = np.arange(max_len, dtype=np.float32)[:, None]               # (max_len, 1)
    div_term = np.exp(np.arange(0, d_model, 2, dtype=np.float32)
                      * (-np.log(10000.0) / d_model))                      # (ceil(d/2),)
    angles = position * div_term                                           # (max_len, ceil(d/2))
    pe = np.zeros((max_len, d_model), dtype=np.float32)
    pe[:, 0::2] = np.sin(angles)
    pe[:, 1::2] = np.cos(angles[:, : d_model // 2])                        # even/odd d_model safe
    return jnp.asarray(pe, dtype=dtype)                                    # (max_len, d_model)


# --------------------------------------------------------------------------- #
# Kernels.
# --------------------------------------------------------------------------- #
def _pe_add_seq_kernel(x_ref, pe_ref, o_ref):
    # x_ref: (B, TS, D), pe_ref: (TS, D) -> broadcast over the batch dim.
    o_ref[...] = (x_ref[...] + pe_ref[...][None, :, :]).astype(o_ref.dtype)


def _pe_add_flat_kernel(x_ref, pe_ref, o_ref):
    # x_ref: (B, TF), pe_ref: (1, TF) -> broadcast over batch sublanes.
    o_ref[...] = (x_ref[...] + pe_ref[...]).astype(o_ref.dtype)


# --------------------------------------------------------------------------- #
# Tile sizing (padding-aware VMEM accounting, >=2 grid steps unless tiny).
# --------------------------------------------------------------------------- #
def _sublane(itemsize: int) -> int:
    # Sublane tile height: 8 rows for 32-bit, 16 for 16-bit, 32 for 8-bit.
    return 8 * max(1, 4 // itemsize)


def _round_up(v: int, m: int) -> int:
    return -(-v // m) * m


_TINY_BYTES = 512 << 10          # below this, megacore sharding doesn't matter
_VMEM_BUDGET = 20 << 20          # block-buffer budget (double buffers included)
_VMEM_LIMIT = 32 << 20           # explicit scoped-VMEM limit, safe on v5e/v6e/v7x


def _choose_flat_tile(B: int, F: int, itemsize: int,
                      budget_bytes: int = _VMEM_BUDGET) -> int:
    """Tile length along the flattened S*D axis (used when d_model % 128 != 0)."""
    sub = _sublane(itemsize)
    # Physical rows: x + out pad B up to the sublane tile; (1, TF) pe pads to a
    # full sublane tile.  Everything is double-buffered by the pipeline.
    padded_rows = 2 * _round_up(B, sub) + sub
    per_col = padded_rows * itemsize * 2
    max_tf = max(128, (budget_bytes // per_col) // 128 * 128)

    if F <= max_tf:
        if F <= 512 or (2 * B + 1) * F * itemsize <= _TINY_BYTES:
            return F                                   # trivially small: one block
        half = -(-F // 2)
        return max(128, _round_up(half, 128))          # >=2 steps for megacore

    # Prefer a tile that divides F exactly (no masked tail store).
    for cand in range(max_tf, max(0, max_tf - 16 * 128), -128):
        if F % cand == 0:
            return cand
    return max_tf


def _choose_seq_tile(B: int, S: int, D: int, itemsize: int,
                     budget_bytes: int = _VMEM_BUDGET) -> int:
    """Tile length along the sequence axis (used when d_model % 128 == 0)."""
    sub = _sublane(itemsize)
    per_row = (2 * B + 1) * D * itemsize * 2            # x + out + pe, double-buffered
    max_ts = max(sub, (budget_bytes // per_row) // sub * sub)

    if S <= max_ts:
        if S <= 2 * sub or (2 * B + 1) * S * D * itemsize <= _TINY_BYTES:
            return S                                    # one block (equals full dim -> legal)
        half = -(-S // 2)
        return max(sub, _round_up(half, sub))           # >=2 steps for megacore

    for cand in range(max_ts, max(0, max_ts - 16 * sub), -sub):
        if S % cand == 0:
            return cand
    return max_ts


# --------------------------------------------------------------------------- #
# Forward.
# --------------------------------------------------------------------------- #
def positional_encoding_forward(x: jnp.ndarray, pe: jnp.ndarray) -> jnp.ndarray:
    """x: (B, S, D); pe: (max_len, D), ideally already in x.dtype. Returns x + pe[:S]."""
    B, S, D = x.shape
    assert pe.shape[0] >= S and pe.shape[1] == D

    if pe.dtype != x.dtype:
        # Fallback only; callers should build pe in the activation dtype at init.
        pe = pe.astype(x.dtype)

    itemsize = jnp.dtype(x.dtype).itemsize
    compiler_params = pltpu.CompilerParams(
        dimension_semantics=("parallel",),               # shardable across TCs (v7x megacore)
        vmem_limit_bytes=_VMEM_LIMIT,
    )

    if D % 128 == 0:
        # Lane-dense in D already; tile the sequence axis, pe blocks are sublane-dense.
        TS = _choose_seq_tile(B, S, D, itemsize)
        grid = (pl.cdiv(S, TS),)
        return pl.pallas_call(
            _pe_add_seq_kernel,
            out_shape=jax.ShapeDtypeStruct((B, S, D), x.dtype),
            grid_spec=pltpu.PrefetchScalarGridSpec(
                num_scalar_prefetch=0,
                grid=grid,
                in_specs=[
                    pl.BlockSpec((B, TS, D), lambda s: (0, s, 0)),  # x tile
                    pl.BlockSpec((TS, D), lambda s: (s, 0)),        # pe tile (no per-call slice)
                ],
                out_specs=pl.BlockSpec((B, TS, D), lambda s: (0, s, 0)),
            ),
            compiler_params=compiler_params,
        )(x, pe)

    # d_model < 128 (or not a multiple of 128): flatten (S, D) -> F for lane-dense stores.
    F = S * D
    x_flat = x.reshape(B, F)
    pe_flat = pe[:S, :].reshape(1, F)                    # contiguous slice, no cast
    TF = _choose_flat_tile(B, F, itemsize)
    grid = (pl.cdiv(F, TF),)

    out_flat = pl.pallas_call(
        _pe_add_flat_kernel,
        out_shape=jax.ShapeDtypeStruct((B, F), x.dtype),
        grid_spec=pltpu.PrefetchScalarGridSpec(
            num_scalar_prefetch=0,
            grid=grid,
            in_specs=[
                pl.BlockSpec((B, TF), lambda f: (0, f)),   # x tile
                pl.BlockSpec((1, TF), lambda f: (0, f)),   # pe tile (broadcast over batch)
            ],
            out_specs=pl.BlockSpec((B, TF), lambda f: (0, f)),
        ),
        compiler_params=compiler_params,
    )(x_flat, pe_flat)

    return out_flat.reshape(B, S, D)


# --------------------------------------------------------------------------- #
# Demo / self-check.
# --------------------------------------------------------------------------- #
if __name__ == "__main__":
    MAX_LEN = 512
    key = jax.random.PRNGKey(0)

    # Path B: small d_model (< 128) -> flattened lane-dense layout.
    B, S, D = 2, 8, 32
    pe = make_positional_encoding(D, MAX_LEN, dtype=jnp.float32)
    x = jax.random.normal(key, (B, S, D), dtype=jnp.float32)
    out = jax.block_until_ready(positional_encoding_forward(x, pe))
    ref = x + pe[None, :S, :]
    np.testing.assert_allclose(np.asarray(out), np.asarray(ref), rtol=1e-6, atol=1e-6)

    # Path A: d_model % 128 == 0 -> sequence-tiled layout with sublane-dense pe blocks.
    B2, S2, D2 = 2, 16, 128
    pe2 = make_positional_encoding(D2, MAX_LEN, dtype=jnp.float32)
    x2 = jax.random.normal(jax.random.PRNGKey(0), (B2, S2, D2), dtype=jnp.float32)
    out2 = jax.block_until_ready(positional_encoding_forward(x2, pe2))
    ref2 = x2 + pe2[None, :S2, :]
    np.testing.assert_allclose(np.asarray(out2), np.asarray(ref2), rtol=1e-6, atol=1e-6)

    print("KERNEL_OK")
</pallas_src>

<mosaic_0001>
module attributes {stable_mosaic.version = 11 : i64} {
  func.func @_pe_add_flat_kernel(%arg0: i32, %arg1: memref<2x256xf32, #tpu.memory_space<vmem>>, %arg2: memref<1x256xf32, #tpu.memory_space<vmem>>, %arg3: memref<2x256xf32, #tpu.memory_space<vmem>>) attributes {dimension_semantics = [#tpu.dimension_semantics<parallel>], iteration_bounds = array<i64: 1>, scalar_prefetch = 0 : i64, scratch_operands = 0 : i64, tpu.core_type = #tpu.core_type<tc>, window_params = [{transform_indices = @transform_0, window_bounds = array<i64: 2, 256>}, {transform_indices = @transform_1, window_bounds = array<i64: 1, 256>}, {transform_indices = @transform_2, window_bounds = array<i64: 2, 256>}]} {
    %c0 = arith.constant 0 : index
    %c0_0 = arith.constant 0 : index
    %0 = vector.load %arg1[%c0, %c0_0] : memref<2x256xf32, #tpu.memory_space<vmem>>, vector<2x256xf32>
    %c0_1 = arith.constant 0 : index
    %c0_2 = arith.constant 0 : index
    %1 = vector.load %arg2[%c0_1, %c0_2] : memref<1x256xf32, #tpu.memory_space<vmem>>, vector<1x256xf32>
    %2 = vector.broadcast %1 : vector<1x256xf32> to vector<2x256xf32>
    %3 = arith.addf %0, %2 : vector<2x256xf32>
    %c0_3 = arith.constant 0 : index
    %c0_4 = arith.constant 0 : index
    %4 = vector.load %arg3[%c0_3, %c0_4] : memref<2x256xf32, #tpu.memory_space<vmem>>, vector<2x256xf32>
    tpu.vector_store %arg3[%c0_3, %c0_4], %3 {strides = array<i32>} : memref<2x256xf32, #tpu.memory_space<vmem>>, vector<2x256xf32>,
    return
  }
  func.func @transform_0(%arg0: i32) -> (i32, i32) {
    %c0_i32 = arith.constant 0 : i32
    %c0_i32_0 = arith.constant 0 : i32
    return %c0_i32, %arg0 : i32, i32
  }
  func.func @transform_1(%arg0: i32) -> (i32, i32) {
    %c0_i32 = arith.constant 0 : i32
    %c0_i32_0 = arith.constant 0 : i32
    return %c0_i32, %arg0 : i32, i32
  }
  func.func @transform_2(%arg0: i32) -> (i32, i32) {
    %c0_i32 = arith.constant 0 : i32
    %c0_i32_0 = arith.constant 0 : i32
    return %c0_i32, %arg0 : i32, i32
  }
}

</mosaic_0001>

<bundles_post_ra>
// kernel: tpu_custom_call.1
= control target key start
LH: loop header
LB: loop body
LE: loop exit
PB: predicated region body
PF: predicated region fallthrough
CT: control target
= control target key end

     0   :  { %7 = vsyncpa [#allocation3], 0  ;;  %s172_s0 = inlined_call_operand.hbm [shape: f32[2,256], index: 0, kind: input, shape index: {}]   ;;  %s173_s1 = inlined_call_operand.hbm [shape: f32[1,256], index: 1, kind: input, shape index: {}]   ;;  %s174_s2 = inlined_call_operand.hbm [shape: f32[2,256], index: 2, kind: output, shape index: {}]  }
   0x1   :  { %8 = vsyncpa [#allocation6], 0 }
   0x2   :  { %9 = vsyncpa [#allocation4], 0  ;;  %s144_s9 = smov [#allocation2]   ;;  %s145_s11 = smov [#allocation5]  }
   0x3   :  { %s16_s10 = sshll.u32 %s144_s9, 4  ;;  %s26_s12 = sshll.u32 %s145_s11, 4  ;;  %s17_s10 = int_to_ptr.vmem [resolvable:$true] %s16_s10  ;;  %s27_s12 = int_to_ptr.vmem [resolvable:$true] %s26_s12 }
   0x4   :  { %s86_s13 = scalar_lea.vmem %s17_s10, 64  ;;  %p91_p1 = scmp.lt.s32.totalorder %s17_s10, %s17_s10 }
   0x5   :  { %p87_p0 = scmp.ne.s32.totalorder %s17_s10, %s86_s13  ;;  %p92_p2 = scmp.lt.s32.totalorder %s86_s13, %s86_s13 }
   0x7   :  { %p93_p3 = por %p92_p2, %p91_p1 }
   0x9   :  { %p94_p4 = pnand %p93_p3, %p87_p0 }
   0xb   :  { %97 = shalt.err (!%p94_p4)
}
   0xc   :  { %19 = dma.hbm_to_vmem [thread:$0]  %s172_s0, 64, %s17_s10, [#allocation3]  }
   0xd   :  { %s106_s16 = scalar_lea.vmem %s27_s12, 32  ;;  %p111_p6 = scmp.lt.s32.totalorder %s27_s12, %s27_s12 }
   0xe   :  { %p107_p5 = scmp.ne.s32.totalorder %s27_s12, %s106_s16  ;;  %p112_p7 = scmp.lt.s32.totalorder %s106_s16, %s106_s16 }
  0x10   :  { %p113_p8 = por %p112_p7, %p111_p6 }
  0x12   :  { %p114_p9 = pnand %p113_p8, %p107_p5 }
  0x14   :  { %117 = shalt.err (!%p114_p9)
}
  0x15   :  { %29 = dma.hbm_to_vmem [thread:$0]  %s173_s1, 32, %s27_s12, [#allocation6]  }
  0x16   :  { %138 = dma.done.wait [#allocation3], 64  }
  0x17   :  { %139 = vsyncadd [#allocation3], 4294967232 }
  0x18   :  { %140 = dma.done.wait [#allocation6], 32  }
  0x19   :  { %141 = vsyncadd [#allocation6], 4294967264  ;;  %v39_v0 = vlaneseq  ;;  %v146_v1 = vmov 1983009808   ;;  %v37_v7 = vld [vmem:[#allocation5] sm:$0x3] }
  0x1a   :  { %v49_v2 = vunpack.c.l.s4 %v146_v1  ;;  %v36_v12 = vld [vmem:[#allocation2] sm:$0xf]  ;;  %s147_s0 = smov [#allocation7]  }
  0x1b   :  { %v40_v3 = vshrl.u32 %v39_v0, 7  ;;  %s64_s19 = sshll.u32 %s147_s0, 4  ;;  %s65_s19 = int_to_ptr.vmem [resolvable:$true] %s64_s19 }
  0x1c   :  { %v50_v6 = vunpack.c.0.s8 %v49_v2  ;;  %s118_s1 = scalar_lea.vmem %s65_s19, 64  ;;  %p123_p11 = scmp.lt.s32.totalorder %s65_s19, %s65_s19 }
  0x1d   :  { %v41_v4 = vsub.s32 0, %v40_v3  ;;  %v45_v5 = vsub.s32 1, %v40_v3  ;;  %p119_p10 = scmp.ne.s32.totalorder %s65_s19, %s118_s1  ;;  %p124_p12 = scmp.lt.s32.totalorder %s118_s1, %s118_s1 }
  0x1e   :  { %v53_v10 = vsub.s32 %v50_v6, %v40_v3 }
  0x1f   :  { %v42_v8 = vrot.slane %v37_v7, %v41_v4  ;;  %v46_v9 = vrot.slane %v37_v7, %v45_v5  ;;  %p125_p13 = por %p124_p12, %p123_p11 }
  0x21   :  { %v47_v11 = vcombine.low %v42_v8, %v46_v9  ;;  %p126_p0 = pnand %p125_p13, %p119_p10 }
  0x23   :  { %v54_v13 = vrot.slane %v47_v11, %v53_v10 }
  0x25   :  { %v56_v14 = vadd.f32 %v54_v13, %v36_v12 }
  0x27   :  { %57 = vst [vmem:[#allocation7] sm:$0xf] %v56_v14 }
  0x28   :  { %129 = shalt.err (!%p126_p0)
}
  0x29   :  { %67 = dma.vmem_to_hbm [thread:$0]  %s65_s19, 64, %s174_s2, [#allocation4]  }
  0x2a   :  { %142 = dma.done.wait [#allocation4], 64  }
  0x2b   :  { %143 = vsyncadd [#allocation4], 4294967232 }
  0x2c   :  { %71 = vsyncpa [#allocation3], 1 }
  0x2d   :  { %72 = vsyncpa [#allocation6], 1 }
  0x2e   :  { %73 = vsyncpa [#allocation4], 1 }

</bundles_post_ra>
